<compile_context>
chip_gen: v7x
topology: tpu7x:2x2x1
jax: 0.10.0
libtpu: 0.0.40
codegen_flags: <defaults>
</compile_context>

<pallas_src>
import functools

import jax
import jax.numpy as jnp
from jax import lax
from jax.experimental import pallas as pl
from jax.experimental.pallas import tpu as pltpu


def _layernorm_kernel(x_ref, g_ref, b_ref, o_ref, *, eps):
    # x_ref: (TM, D) block of rows in the input's native dtype.
    # g_ref/b_ref: (1, D) LayerNorm weight / bias (resident in VMEM every step).
    x = x_ref[...].astype(jnp.float32)                        # f32 stats only in-kernel
    mean = jnp.mean(x, axis=-1, keepdims=True)                # (TM, 1)
    xc = x - mean
    var = jnp.mean(xc * xc, axis=-1, keepdims=True)           # biased var (== torch)
    inv = lax.rsqrt(var + eps)                                # EUP rsqrt
    y = xc * inv * g_ref[...].astype(jnp.float32) + b_ref[...].astype(jnp.float32)
    o_ref[...] = y.astype(o_ref.dtype)


def _pick_block_rows(n_rows, dim, itemsize):
    """Rows per grid step: multiple of 8 (sublane-dense), ~<=2 MiB per input
    buffer (double-buffered), and >=2 grid tiles when possible so the
    'parallel' axis can shard across both TensorCores on megacore parts."""
    if n_rows <= 8:
        return n_rows
    bytes_per_row = max(dim * itemsize, 1)
    tm = min(n_rows, 512, max(8, (2 * 1024 * 1024) // bytes_per_row))
    tm = max(8, (tm // 8) * 8)
    if tm >= n_rows and n_rows >= 16:          # keep at least 2 tiles
        tm = max(8, ((n_rows // 2) // 8) * 8)
    return tm


def layer_norm_pallas(x, gamma, beta, *, eps=1e-5, block_rows=None):
    """LayerNorm over the last dim of x (any leading shape). The input keeps
    its native dtype end-to-end; no wrapper upcast / extra HBM copy."""
    orig_shape = x.shape
    D = orig_shape[-1]
    R = 1
    for s in orig_shape[:-1]:
        R *= s

    x2 = x.reshape(R, D)                       # native dtype, no astype
    g2 = gamma.reshape(1, D)
    b2 = beta.reshape(1, D)

    TM = block_rows if block_rows is not None else _pick_block_rows(
        R, D, x2.dtype.itemsize)
    R_pad = pl.cdiv(R, TM) * TM
    if R_pad != R:
        x2 = jnp.pad(x2, ((0, R_pad - R), (0, 0)))
    grid = (R_pad // TM,)

    itemsize = x2.dtype.itemsize
    cost = pl.CostEstimate(                     # memory-bound hint for XLA
        flops=8 * R * D,
        transcendentals=R,                      # one rsqrt per row
        bytes_accessed=2 * R * D * itemsize + 2 * D * g2.dtype.itemsize,
    )

    out = pl.pallas_call(
        functools.partial(_layernorm_kernel, eps=eps),
        out_shape=jax.ShapeDtypeStruct((R_pad, D), x.dtype),
        grid_spec=pltpu.PrefetchScalarGridSpec(
            num_scalar_prefetch=0,
            grid=grid,
            in_specs=[
                pl.BlockSpec((TM, D), lambda i: (i, 0)),   # rows of x
                pl.BlockSpec((1, D), lambda i: (0, 0)),    # gamma (resident)
                pl.BlockSpec((1, D), lambda i: (0, 0)),    # beta  (resident)
            ],
            out_specs=pl.BlockSpec((TM, D), lambda i: (i, 0)),
        ),
        compiler_params=pltpu.CompilerParams(
            dimension_semantics=("parallel",)),
        cost_estimate=cost,
    )(x2, g2, b2)

    if R_pad != R:
        out = out[:R]
    return out.reshape(orig_shape)


def layer_normalize_forward(x, gamma, beta, fn=None, eps=1e-5, **kwargs):
    """Equivalent of LayerNormalize.forward: fn(LayerNorm(dim)(x), **kwargs)."""
    y = layer_norm_pallas(x, gamma, beta, eps=eps)
    # TODO(synk): `fn` is an arbitrary wrapped sub-module in PyTorch; here it is
    # any JAX callable applied outside the Pallas kernel.
    if fn is not None:
        y = fn(y, **kwargs)
    return y


def layer_norm_reference(x, gamma, beta, eps=1e-5):
    x32 = x.astype(jnp.float32)
    mean = jnp.mean(x32, axis=-1, keepdims=True)
    var = jnp.mean((x32 - mean) ** 2, axis=-1, keepdims=True)
    y = (x32 - mean) * lax.rsqrt(var + eps) * gamma.astype(jnp.float32) \
        + beta.astype(jnp.float32)
    return y.astype(x.dtype)


if __name__ == "__main__":
    # LayerNormalize(dim=32, fn=gelu) on a (batch=2, seq=8, hidden=32) input.
    B, S, D = 2, 8, 32
    key = jax.random.PRNGKey(0)
    kx, kg, kb = jax.random.split(key, 3)

    x = jax.random.normal(kx, (B, S, D), dtype=jnp.float32)
    gamma = 1.0 + 0.1 * jax.random.normal(kg, (D,), dtype=jnp.float32)
    beta = 0.1 * jax.random.normal(kb, (D,), dtype=jnp.float32)

    fn = jax.nn.gelu      # stand-in for the wrapped sub-module `fn`

    out = layer_normalize_forward(x, gamma, beta, fn=fn)
    out = jax.block_until_ready(out)

    ref = fn(layer_norm_reference(x, gamma, beta))
    assert out.shape == (B, S, D)
    assert jnp.allclose(out, ref, atol=1e-5, rtol=1e-5), "mismatch vs reference"

    print("KERNEL_OK")
</pallas_src>

<mosaic_0001>
module attributes {stable_mosaic.version = 11 : i64} {
  func.func @_layernorm_kernel(%arg0: i32, %arg1: memref<8x32xf32, #tpu.memory_space<vmem>>, %arg2: memref<1x32xf32, #tpu.memory_space<vmem>>, %arg3: memref<1x32xf32, #tpu.memory_space<vmem>>, %arg4: memref<8x32xf32, #tpu.memory_space<vmem>>) attributes {dimension_semantics = [#tpu.dimension_semantics<parallel>], iteration_bounds = array<i64: 2>, scalar_prefetch = 0 : i64, scratch_operands = 0 : i64, tpu.core_type = #tpu.core_type<tc>, window_params = [{transform_indices = @transform_0, window_bounds = array<i64: 8, 32>}, {pipeline_mode = #tpu.pipeline_mode<synchronous>, transform_indices = @transform_1, window_bounds = array<i64: 1, 32>}, {pipeline_mode = #tpu.pipeline_mode<synchronous>, transform_indices = @transform_2, window_bounds = array<i64: 1, 32>}, {transform_indices = @transform_3, window_bounds = array<i64: 8, 32>}]} {
    %c0 = arith.constant 0 : index
    %c0_0 = arith.constant 0 : index
    %0 = vector.load %arg1[%c0, %c0_0] : memref<8x32xf32, #tpu.memory_space<vmem>>, vector<8x32xf32>
    %cst = arith.constant dense<0.000000e+00> : vector<8xf32>
    %1 = vector.multi_reduction <add>, %0, %cst [1] : vector<8x32xf32> to vector<8xf32>
    %2 = vector.shape_cast %1 : vector<8xf32> to vector<8x1xf32>
    %cst_1 = arith.constant 3.200000e+01 : f32
    %3 = vector.broadcast %cst_1 : f32 to vector<8x1xf32>
    %4 = arith.divf %2, %3 : vector<8x1xf32>
    %5 = vector.broadcast %4 : vector<8x1xf32> to vector<8x32xf32>
    %6 = arith.subf %0, %5 : vector<8x32xf32>
    %7 = arith.mulf %6, %6 : vector<8x32xf32>
    %cst_2 = arith.constant dense<0.000000e+00> : vector<8xf32>
    %8 = vector.multi_reduction <add>, %7, %cst_2 [1] : vector<8x32xf32> to vector<8xf32>
    %9 = vector.shape_cast %8 : vector<8xf32> to vector<8x1xf32>
    %cst_3 = arith.constant 3.200000e+01 : f32
    %10 = vector.broadcast %cst_3 : f32 to vector<8x1xf32>
    %11 = arith.divf %9, %10 : vector<8x1xf32>
    %cst_4 = arith.constant 9.99999974E-6 : f32
    %12 = vector.broadcast %cst_4 : f32 to vector<8x1xf32>
    %13 = arith.addf %11, %12 : vector<8x1xf32>
    %14 = math.rsqrt %13 : vector<8x1xf32>
    %15 = vector.broadcast %14 : vector<8x1xf32> to vector<8x32xf32>
    %16 = arith.mulf %6, %15 : vector<8x32xf32>
    %c0_5 = arith.constant 0 : index
    %c0_6 = arith.constant 0 : index
    %17 = vector.load %arg2[%c0_5, %c0_6] : memref<1x32xf32, #tpu.memory_space<vmem>>, vector<1x32xf32>
    %18 = vector.broadcast %17 : vector<1x32xf32> to vector<8x32xf32>
    %19 = arith.mulf %16, %18 : vector<8x32xf32>
    %c0_7 = arith.constant 0 : index
    %c0_8 = arith.constant 0 : index
    %20 = vector.load %arg3[%c0_7, %c0_8] : memref<1x32xf32, #tpu.memory_space<vmem>>, vector<1x32xf32>
    %21 = vector.broadcast %20 : vector<1x32xf32> to vector<8x32xf32>
    %22 = arith.addf %19, %21 : vector<8x32xf32>
    %c0_9 = arith.constant 0 : index
    %c0_10 = arith.constant 0 : index
    %23 = vector.load %arg4[%c0_9, %c0_10] : memref<8x32xf32, #tpu.memory_space<vmem>>, vector<8x32xf32>
    tpu.vector_store %arg4[%c0_9, %c0_10], %22 {strides = array<i32>} : memref<8x32xf32, #tpu.memory_space<vmem>>, vector<8x32xf32>,
    return
  }
  func.func @transform_0(%arg0: i32) -> (i32, i32) {
    %c0_i32 = arith.constant 0 : i32
    %c0_i32_0 = arith.constant 0 : i32
    return %arg0, %c0_i32 : i32, i32
  }
  func.func @transform_1(%arg0: i32) -> (i32, i32) {
    %c0_i32 = arith.constant 0 : i32
    %c0_i32_0 = arith.constant 0 : i32
    %c0_i32_1 = arith.constant 0 : i32
    return %c0_i32, %c0_i32_0 : i32, i32
  }
  func.func @transform_2(%arg0: i32) -> (i32, i32) {
    %c0_i32 = arith.constant 0 : i32
    %c0_i32_0 = arith.constant 0 : i32
    %c0_i32_1 = arith.constant 0 : i32
    return %c0_i32, %c0_i32_0 : i32, i32
  }
  func.func @transform_3(%arg0: i32) -> (i32, i32) {
    %c0_i32 = arith.constant 0 : i32
    %c0_i32_0 = arith.constant 0 : i32
    return %arg0, %c0_i32 : i32, i32
  }
}

</mosaic_0001>

<bundles_post_ra>
// kernel: tpu_custom_call.1
= control target key start
LH: loop header
LB: loop body
LE: loop exit
PB: predicated region body
PF: predicated region fallthrough
CT: control target
= control target key end

     0   :  { %8 = vsyncpa [#allocation3], 0  ;;  %s655_s0 = inlined_call_operand.hbm [shape: f32[16,32], index: 0, kind: input, shape index: {}]   ;;  %s656_s1 = inlined_call_operand.vmem [shape: f32[1,32], index: 1, kind: input, shape index: {}]   ;;  %s657_s2 = inlined_call_operand.vmem [shape: f32[1,32], index: 2, kind: input, shape index: {}]   ;;  %s658_s3 = inlined_call_operand.hbm [shape: f32[16,32], index: 3, kind: output, shape index: {}]  }
   0x1   :  { %10 = vsyncpa [#allocation3 + $0x1], 0 }
   0x2   :  { %11 = vsyncpa [#allocation4], 0 }
   0x3   :  { %13 = vsyncpa [#allocation4 + $0x1], 0  ;;  %s485_s12 = smov 0   ;;  %s487_s13 = smov 0  }
   0x4   :  { %s489_s14 = smov 0   ;;  %s491_s15 = smov 0  }
   0x5 LB: > { %s506_s16 = sadd.s32 4294967295, %s461_s15   ;;  %s303_s17 = sadd.s32 4294967294, %s461_s15   ;;  %s461_s15 = sphi %s491_s15, %s673_s15   ;;  %s457_s14 = sphi %s489_s14, %s672_s14   ;;  %s453_s13 = sphi %s487_s13, %s671_s13   ;;  %s449_s12 = sphi %s485_s12, %s670_s12  }
   0x6   : > { %s510_s18 = sadd.s32 1, %s461_s15   ;;  %s26_s19 = sadd.s32 1, %s457_s14 }
   0x7   : > { %s23_s20 = ssub.s32 %s461_s15, %s510_s18  ;;  %p33_p0 = scmp.ne.s32.totalorder %s457_s14, %s453_s13 }
   0x8   : > { %p24_p1 = scmp.eq.s32.totalorder %s23_s20, 0  ;;  %p34_p2 = scmp.eq.s32.totalorder %s461_s15, 0 }
   0x9   : > { %p39_p3 = scmp.ne.s32.totalorder %s453_s13, %s449_s12  ;;  %p40_p4 = scmp.eq.s32.totalorder %s506_s16, 0 }
   0xa   : > { %s522_s21 = scalar_select %p24_p1, %s457_s14, %s26_s19  }
   0xb   : > { %p524_p5 = por %p34_p2, %p33_p0  ;;  %p528_p6 = por %p40_p4, %p39_p3 }
   0xc   : > { %p105_p7 = scmp.eq.s32.totalorder %s506_s16, 1  ;;  %p111_p8 = scmp.eq.s32.totalorder %s303_s17, 1 }
   0xd   : > { %p329_p10 = scmp.lt.s32.totalorder %s461_s15, 2  ;;  %s137_s26 = sand.u32 1, %s457_s14  }
   0xe   : > { %p535_p11 = por %p105_p7, %p33_p0  ;;  %p539_p12 = por %p111_p8, %p39_p3 }
   0xf   : > { %s307_s27 = sshll.u32 %s461_s15, 7  ;;  %s306_s28 = sshll.u32 %s137_s26, 3 }
  0x10   : > { %s662_s24 = scalar_select %p535_p11, 1, 0 }
  0x11   : > { %s663_s25 = scalar_select %p539_p12, 1, 0 }
  0x12   : > { %s548_s4 = scalar_lea.hbm %s655_s0, %s307_s27  ;;  %s141_s5 = scalar_lea.vmem [#allocation2], %s306_s28 }
  0x13   : > { %s148_s6 = sshll.u32 %s141_s5, 4  ;;  %p552_p13 = pnand %p329_p10, %p524_p5  ;;  %s556_s6 = int_to_ptr.vmem [resolvable:$true] %s148_s6 }
  0x14   : > { %s138_s8 = scalar_lea.sflag [#allocation3], %s137_s26  ;;  %s365_s9 = scalar_lea.hbm %s548_s4, 128 }
  0x15   : > { %p366_p2 = scmp.ne.s32.totalorder %s548_s4, %s365_s9  ;;  %p367_p3 = pneg %p552_p13 }
  0x16   : > { %s370_s17 = scalar_lea.hbm %s655_s0, 256  ;;  %p371_p5 = scmp.lt.u32.totalorder %s548_s4, %s655_s0 }
  0x17   : > { %p368_p4 = pnand %p367_p3, %p366_p2  ;;  %p372_p8 = scmp.lt.u32.totalorder %s370_s17, %s365_s9 }
  0x18   : > { %p374_p9 = scmp.lt.u32.totalorder %s365_s9, %s548_s4 }
  0x19   : > { %p369_p7 = pneg %p368_p4  ;;  %p373_p10 = por %p372_p8, %p371_p5 }
  0x1b   : > { %p375_p0 = por %p374_p9, %p373_p10 }
  0x1d   : > { %p376_p1 = pnand %p375_p0, %p369_p7 }
  0x1f   : > { %379 = shalt.err (!%p376_p1)
}
  0x20   : > { %s380_s22 = scalar_lea.vmem %s556_s6, 128  ;;  %s463_s26 = smov [#allocation2]  }
  0x21   : > { %p381_p2 = scmp.ne.s32.totalorder %s556_s6, %s380_s22  ;;  %s385_s27 = sshll.u32 %s463_s26, 4  ;;  %s386_s27 = int_to_ptr.vmem [resolvable:$false] %s385_s27 }
  0x22   : > { %s387_s28 = scalar_lea.vmem %s386_s27, 256  ;;  %p388_p11 = scmp.lt.s32.totalorder %s556_s6, %s386_s27 }
  0x23   : > { %p383_p4 = pnand %p381_p2, %p367_p3  ;;  %p389_p5 = scmp.lt.s32.totalorder %s387_s28, %s380_s22 }
  0x25   : > { %p384_p12 = pneg %p383_p4  ;;  %p390_p8 = por %p389_p5, %p388_p11 }
  0x27   : > { %p391_p9 = pnand %p390_p8, %p384_p12 }
  0x29   : > { %394 = shalt.err (!%p391_p9)
}
  0x2a   : > { %324 = dma.hbm_to_vmem [thread:$0]  (!%p552_p13), %s548_s4, 128, %s556_s6, %s138_s8  }
  0x2b   : > { %p665_p0 = scmp.lt.s32.totalorder %s461_s15, 3  ;;  %p666_p1 = scmp.ge.s32.totalorder %s461_s15, 1 }
  0x2d   : > { %p154_p3 = pnand %p666_p1, %p665_p0 }
  0x2e   : > { %s590_s29 = sand.u32 (!%p154_p3), 1, %s453_s13  }
  0x2f   : > { %157 = sbr.rel (%p154_p3) target bundleno = 383 (0x17f), region = 32  ;;  %s309_s30 = sshll.u32 (!%p154_p3), %s590_s29, 3 }
  0x30   : > { %s160_s5 = scalar_lea.sflag (!%p154_p3), [#allocation3], %s590_s29  ;;  %s163_s9 = scalar_lea.vmem (!%p154_p3), [#allocation2], %s309_s30 }
  0x36   : > { %440 = dma.done.wait (%p528_p6), %s160_s5, 128  }
  0x37   : > { %442 = vsyncadd (%p528_p6), %s160_s5, 4294967168  ;;  %vm187_vm0 = vcmask 261120   ;;  %v186_v0 = vld [vmem:[%s163_s9] sm:$0xff]  ;;  %s314_s8 = sshll.u32 %s506_s16, 7  ;;  %s185_s10 = scalar_lea.vmem [#allocation5], %s309_s30 }
  0x38   : > { %v188_v1 = vsel %vm187_vm0, %v186_v0, 0.0  ;;  %v311_v11 = vld [vmem:[%s656_s1] ss:$0 sm:$0xff]  ;;  %s233_s11 = sshll.u32 %s185_s10, 4  ;;  %s610_s20 = scalar_lea.hbm %s658_s3, %s314_s8  ;;  %s612_s11 = int_to_ptr.vmem [resolvable:$true] %s233_s11 }
  0x39   : > { %189 = vadd.xlane.f32.xlu0 %v188_v1  ;;  %v312_v13 = vld [vmem:[%s657_s2] ss:$0 sm:$0xff]  ;;  %s220_s22 = scalar_lea.sflag [#allocation4], %s590_s29  ;;  %s395_s26 = scalar_lea.vmem %s612_s11, 128 }
  0x3a   : > { %p396_p6 = scmp.ne.s32.totalorder %s612_s11, %s395_s26  ;;  %p667_p11 = scmp.ne.s32.totalorder %s662_s24, 0 }
  0x3b   : > { %s464_s16 = smov [#allocation5]  }
  0x3c   : > { %p397_p12 = pnand %p396_p6, %p667_p11  ;;  %s399_s27 = sshll.u32 %s464_s16, 4  ;;  %s400_s27 = int_to_ptr.vmem [resolvable:$false] %s399_s27 }
  0x3d   : > { %s401_s28 = scalar_lea.vmem %s400_s27, 256  ;;  %p402_p7 = scmp.lt.s32.totalorder %s612_s11, %s400_s27 }
  0x3e   : > { %p398_p13 = pneg %p397_p12  ;;  %p403_p10 = scmp.lt.s32.totalorder %s401_s28, %s395_s26 }
  0x40   : > { %p404_p2 = por %p403_p10, %p402_p7 }
  0x42   : > { %p405_p4 = pnand %p404_p2, %p398_p13 }
  0xc6   : > { %v190_v2 = vpop.xlane.xlu0 %189 }
  0xc7   : > { %v192_v3 = vmul.f32 0.03125, %v190_v2 }
  0xc9   : > { %v193_v4 = vsub.f32 %v186_v0, %v192_v3 }
  0xcb   : > { %v194_v5 = vmul.f32 %v193_v4, %v193_v4 }
  0xcd   : > { %v195_v6 = vsel %vm187_vm0, %v194_v5, 0.0 }
  0xce   : > { %196 = vadd.xlane.f32.xlu0 %v195_v6 }
 0x15b   : > { %v197_v7 = vpop.xlane.xlu0 %196 }
 0x15c   : > { %v198_v8 = vmul.f32 0.03125, %v197_v7 }
 0x15e   : > { %v199_v9 = vadd.f32 1e-05, %v198_v8 }
 0x160   : > { %363 = vrsqrt.f32 %v199_v9 }
 0x16a   : > { %v364_v10 = vpop.eup %363 }
 0x16b   : > { %v201_v12 = vmul.f32 %v364_v10, %v193_v4 }
 0x16d   : > { %v209_v14 = vmul.f32 %v311_v11, %v201_v12 }
 0x16f   : > { %v217_v15 = vadd.f32 %v312_v13, %v209_v14 }
 0x171   : > { %218 = vst.msk [vmem:[%s185_s10] sm:$0xff] %vm187_vm0, %v217_v15 }
 0x172   : > { %408 = shalt.err (!%p405_p4)
}
 0x173   : > { %s409_s29 = scalar_lea.hbm %s610_s20, 128  ;;  %s413_s9 = scalar_lea.hbm %s658_s3, 256 }
 0x174   : > { %p410_p5 = scmp.ne.s32.totalorder %s610_s20, %s409_s29  ;;  %p414_p0 = scmp.lt.u32.totalorder %s610_s20, %s658_s3 }
 0x175   : > { %p415_p1 = scmp.lt.u32.totalorder %s413_s9, %s409_s29  ;;  %p417_p6 = scmp.lt.u32.totalorder %s409_s29, %s610_s20 }
 0x176   : > { %p411_p8 = pnand %p410_p5, %p667_p11 }
 0x177   : > { %p416_p3 = por %p415_p1, %p414_p0 }
 0x178   : > { %p412_p9 = pneg %p411_p8 }
 0x179   : > { %p418_p12 = por %p417_p6, %p416_p3 }
 0x17b   : > { %p419_p13 = pnand %p418_p12, %p412_p9 }
 0x17d   : > { %422 = shalt.err (!%p419_p13)
}
 0x17e   : > { %319 = dma.vmem_to_hbm [thread:$0]  (%p667_p11), %s612_s11, 128, %s610_s20, %s220_s22  }
 0x17f PF: > { %s245_s6 = sand.u32 1, %s449_s12   ;;  %p668_p7 = scmp.ne.s32.totalorder %s663_s25, 0 }
 0x180   : > { %p669_p10 = scmp.ge.s32.totalorder %s461_s15, 2  ;;  %s246_s7 = scalar_lea.sflag [#allocation4], %s245_s6 }
 0x182   : > { %p326_p2 = pnand %p669_p10, %p668_p7 }
 0x184   : > { %444 = dma.done.wait (!%p326_p2), %s246_s7, 128  }
 0x185   : > { %446 = vsyncadd (!%p326_p2), %s246_s7, 4294967168  ;;  %p16_p4 = scmp.ge.s32.totalorder %s510_s18, 4   ;;  %s670_s12 = smov %s453_s13 }
 0x186   : > { %s671_s13 = smov %s457_s14  ;;  %s672_s14 = smov %s522_s21 }
 0x187   : > { %s673_s15 = smov %s510_s18  ;;  %18 = sbr.rel (!%p16_p4) target bundleno = 5 (0x5), region = 77 }
 0x18e   :  { %251 = vsyncpa [#allocation3], 1 }
 0x18f   :  { %253 = vsyncpa [#allocation3 + $0x1], 1 }
 0x190   :  { %254 = vsyncpa [#allocation4], 1 }
 0x191   :  { %256 = vsyncpa [#allocation4 + $0x1], 1 }

</bundles_post_ra>
